<compile_context>
chip_gen: v6e
topology: v6e:2x2x1
jax: 0.10.0
libtpu: 0.0.40
codegen_flags: <defaults>
</compile_context>

<pallas_src>
import functools

import jax
import jax.numpy as jnp
from jax.experimental import pallas as pl
from jax.experimental.pallas import tpu as pltpu

CUTOFF_LOWER = 1e-12
CUTOFF_UPPER = 5.0
NUM_RBF = 50
ALPHA = 5.0 / (CUTOFF_UPPER - CUTOFF_LOWER)


def smeared_kernel(xq_ref, xkt_ref, means_ref, betas_ref, w1_ref, b1_ref, w2_ref, b2_ref, o_ref):
    # xq_ref : (1, TQ, D)  query coordinates for this tile
    # xkt_ref: (1, D, N)   all key coordinates, pre-transposed in the wrapper
    xq = xq_ref[0]                                  # (TQ, D)
    xkt = xkt_ref[0]                                # (D, N)
    TQ, D = xq.shape
    N = xkt.shape[1]
    RP = means_ref.shape[1]                         # padded rbf width (64)
    H = w1_ref.shape[1]

    # Lane-dense pairwise squared distance: accumulate per coordinate on (TQ, N).
    dist = jnp.zeros((TQ, N), jnp.float32)
    for d in range(D):                              # D = 3, static unroll
        diff = xq[:, d:d + 1] - xkt[d:d + 1, :]     # (TQ, 1) - (1, N) -> (TQ, N)
        dist = dist + diff * diff

    # ExpNormal smearing. The inner exp is R-independent: one exp per (i, j) pair.
    s = jnp.exp(ALPHA * (CUTOFF_LOWER - dist))      # (TQ, N)
    means = means_ref[...].reshape(1, 1, RP)
    betas = betas_ref[...].reshape(1, 1, RP)
    t = s[:, :, None] - means                       # (TQ, N, RP)
    rbf = jnp.exp(-betas * t * t)                   # padded lanes give 1.0 (beta=0)

    # Linear(R->H) + SiLU on (TQ*N, RP) rows; padded W1 rows are zero -> exact.
    h1 = jnp.dot(rbf.reshape(TQ * N, RP), w1_ref[...],
                 preferred_element_type=jnp.float32) + b1_ref[...]
    h1 = h1 * jax.nn.sigmoid(h1)                    # SiLU, (TQ*N, H)

    # Commute the j-mean ahead of the second Linear (exact by linearity):
    #   mean_j(silu(h1) @ W2 + b2) == mean_j(silu(h1)) @ W2 + b2
    m = jnp.mean(h1.reshape(TQ, N, H), axis=1)      # (TQ, H)
    out = jnp.dot(m, w2_ref[...], preferred_element_type=jnp.float32) + b2_ref[...]
    o_ref[0] = out                                  # (TQ, H)


def _pick_tq(n):
    if n <= 128:
        return n
    for t in (128, 64, 32, 16, 8):
        if n % t == 0:
            return t
    return n  # fall back to whole axis


@functools.partial(jax.jit, static_argnames=("tq",))
def smeared_forward(x, means, betas, w1, b1, w2, b2, *, tq=None):
    B, N, D = x.shape
    R = means.shape[-1]
    H = w1.shape[1]

    # Pad the rbf dimension to a lane-friendly width. beta=0 in the pad lanes makes
    # rbf=1 there, and the matching zero rows of W1 make their contribution exactly 0.
    RP = ((R + 63) // 64) * 64
    pad = RP - R
    means_p = jnp.pad(means.reshape(1, R), ((0, 0), (0, pad)))
    betas_p = jnp.pad(betas.reshape(1, R), ((0, 0), (0, pad)))
    w1_p = jnp.pad(w1, ((0, pad), (0, 0)))

    # Keys are passed transposed so the kernel never transposes in VMEM.
    xt = jnp.swapaxes(x, -1, -2)                    # (B, D, N)

    if tq is None:
        tq = _pick_tq(N)
    assert N % tq == 0, (N, tq)
    nq = N // tq

    b1_ = b1.reshape(1, H)
    b2_ = b2.reshape(1, H)

    return pl.pallas_call(
        smeared_kernel,
        out_shape=jax.ShapeDtypeStruct((B, N, H), jnp.float32),
        grid_spec=pltpu.PrefetchScalarGridSpec(
            num_scalar_prefetch=0,
            grid=(B, nq),
            in_specs=[
                pl.BlockSpec((1, tq, D), lambda b, q: (b, q, 0)),   # query tile
                pl.BlockSpec((1, D, N), lambda b, q: (b, 0, 0)),    # all keys (transposed)
                pl.BlockSpec((1, RP), lambda b, q: (0, 0)),         # means (padded)
                pl.BlockSpec((1, RP), lambda b, q: (0, 0)),         # betas (padded)
                pl.BlockSpec((RP, H), lambda b, q: (0, 0)),         # W1 (padded rows)
                pl.BlockSpec((1, H), lambda b, q: (0, 0)),          # b1
                pl.BlockSpec((H, H), lambda b, q: (0, 0)),          # W2
                pl.BlockSpec((1, H), lambda b, q: (0, 0)),          # b2
            ],
            out_specs=pl.BlockSpec((1, tq, H), lambda b, q: (b, q, 0)),
        ),
        compiler_params=pltpu.CompilerParams(
            dimension_semantics=("parallel", "parallel")),
    )(x, xt, means_p, betas_p, w1_p, b1_, w2, b2_)


def make_smearing_params():
    # Matches ExpNormalSmearing._initial_params (trainable=False buffers).
    start_value = jnp.exp(jnp.float32(-CUTOFF_UPPER + CUTOFF_LOWER))
    means = jnp.linspace(start_value, 1.0, NUM_RBF, dtype=jnp.float32).reshape(1, NUM_RBF)
    betas = jnp.full(
        (1, NUM_RBF), (2.0 / NUM_RBF * (1.0 - start_value)) ** (-2), dtype=jnp.float32
    )
    return means, betas


def make_linear_params(key, fan_in, fan_out):
    # Deterministic init mirroring torch.nn.Linear's default uniform(-1/sqrt(in), 1/sqrt(in)).
    kw, kb = jax.random.split(key)
    bound = 1.0 / jnp.sqrt(jnp.float32(fan_in))
    # Stored already transposed: (fan_in, fan_out) so the kernel does x @ W.
    w = jax.random.uniform(kw, (fan_in, fan_out), jnp.float32, -bound, bound)
    b = jax.random.uniform(kb, (1, fan_out), jnp.float32, -bound, bound)
    return w, b


def reference_forward(x, means, betas, w1, b1, w2, b2):
    # Direct transcription of the PyTorch module (mean AFTER the second Linear).
    delta = x[:, :, None, :] - x[:, None, :, :]
    dist = jnp.sum(delta * delta, axis=-1)[..., None]                # (B, N, N, 1)
    rbf = jnp.exp(-betas[0] * (jnp.exp(ALPHA * (CUTOFF_LOWER - dist)) - means[0]) ** 2)
    h1 = rbf @ w1 + b1[0]
    h1 = h1 * jax.nn.sigmoid(h1)
    h2 = h1 @ w2 + b2[0]
    return h2.mean(axis=-2)


if __name__ == "__main__":
    B, N, D = 2, 8, 3        # batch of point clouds, 8 points, 3-D coordinates
    HIDDEN = 32

    key = jax.random.PRNGKey(0)
    kx, k1, k2 = jax.random.split(key, 3)
    x = jax.random.normal(kx, (B, N, D), dtype=jnp.float32)

    means, betas = make_smearing_params()
    w1, b1 = make_linear_params(k1, NUM_RBF, HIDDEN)
    w2, b2 = make_linear_params(k2, HIDDEN, HIDDEN)

    out = smeared_forward(x, means, betas, w1, b1, w2, b2)
    out = jax.block_until_ready(out)

    ref = reference_forward(x, means, betas, w1, b1, w2, b2)
    assert out.shape == (B, N, HIDDEN), out.shape
    assert jnp.allclose(out, ref, atol=2e-5, rtol=2e-5), float(jnp.max(jnp.abs(out - ref)))

    print("KERNEL_OK")
</pallas_src>

<mosaic_0001>
module attributes {stable_mosaic.version = 11 : i64} {
  func.func @smeared_kernel(%arg0: i32, %arg1: i32, %arg2: memref<1x8x3xf32, #tpu.memory_space<vmem>>, %arg3: memref<1x3x8xf32, #tpu.memory_space<vmem>>, %arg4: memref<1x64xf32, #tpu.memory_space<vmem>>, %arg5: memref<1x64xf32, #tpu.memory_space<vmem>>, %arg6: memref<64x32xf32, #tpu.memory_space<vmem>>, %arg7: memref<1x32xf32, #tpu.memory_space<vmem>>, %arg8: memref<32x32xf32, #tpu.memory_space<vmem>>, %arg9: memref<1x32xf32, #tpu.memory_space<vmem>>, %arg10: memref<1x8x32xf32, #tpu.memory_space<vmem>>) attributes {dimension_semantics = [#tpu.dimension_semantics<parallel>, #tpu.dimension_semantics<parallel>], iteration_bounds = array<i64: 2, 1>, scalar_prefetch = 0 : i64, scratch_operands = 0 : i64, tpu.core_type = #tpu.core_type<tc>, window_params = [{transform_indices = @transform_0, window_bounds = array<i64: 1, 8, 3>}, {transform_indices = @transform_1, window_bounds = array<i64: 1, 3, 8>}, {pipeline_mode = #tpu.pipeline_mode<synchronous>, transform_indices = @transform_2, window_bounds = array<i64: 1, 64>}, {pipeline_mode = #tpu.pipeline_mode<synchronous>, transform_indices = @transform_3, window_bounds = array<i64: 1, 64>}, {pipeline_mode = #tpu.pipeline_mode<synchronous>, transform_indices = @transform_4, window_bounds = array<i64: 64, 32>}, {pipeline_mode = #tpu.pipeline_mode<synchronous>, transform_indices = @transform_5, window_bounds = array<i64: 1, 32>}, {pipeline_mode = #tpu.pipeline_mode<synchronous>, transform_indices = @transform_6, window_bounds = array<i64: 32, 32>}, {pipeline_mode = #tpu.pipeline_mode<synchronous>, transform_indices = @transform_7, window_bounds = array<i64: 1, 32>}, {transform_indices = @transform_8, window_bounds = array<i64: 1, 8, 32>}]} {
    %c0 = arith.constant 0 : index
    %c0_0 = arith.constant 0 : index
    %c0_1 = arith.constant 0 : index
    %0 = vector.load %arg2[%c0, %c0_0, %c0_1] : memref<1x8x3xf32, #tpu.memory_space<vmem>>, vector<1x8x3xf32>
    %1 = vector.shape_cast %0 : vector<1x8x3xf32> to vector<8x3xf32>
    %c0_2 = arith.constant 0 : index
    %c0_3 = arith.constant 0 : index
    %c0_4 = arith.constant 0 : index
    %2 = vector.load %arg3[%c0_2, %c0_3, %c0_4] : memref<1x3x8xf32, #tpu.memory_space<vmem>>, vector<1x3x8xf32>
    %3 = vector.shape_cast %2 : vector<1x3x8xf32> to vector<3x8xf32>
    %cst = arith.constant 0.000000e+00 : f32
    %4 = vector.broadcast %cst : f32 to vector<8x8xf32>
    %5 = vector.extract_strided_slice %1 {offsets = [0, 0], sizes = [8, 1], strides = [1, 1]} : vector<8x3xf32> to vector<8x1xf32>
    %6 = vector.extract_strided_slice %3 {offsets = [0, 0], sizes = [1, 8], strides = [1, 1]} : vector<3x8xf32> to vector<1x8xf32>
    %7 = vector.broadcast %5 : vector<8x1xf32> to vector<8x8xf32>
    %8 = vector.broadcast %6 : vector<1x8xf32> to vector<8x8xf32>
    %9 = arith.subf %7, %8 : vector<8x8xf32>
    %10 = arith.mulf %9, %9 : vector<8x8xf32>
    %11 = arith.addf %4, %10 : vector<8x8xf32>
    %12 = vector.extract_strided_slice %1 {offsets = [0, 1], sizes = [8, 1], strides = [1, 1]} : vector<8x3xf32> to vector<8x1xf32>
    %13 = vector.extract_strided_slice %3 {offsets = [1, 0], sizes = [1, 8], strides = [1, 1]} : vector<3x8xf32> to vector<1x8xf32>
    %14 = vector.broadcast %12 : vector<8x1xf32> to vector<8x8xf32>
    %15 = vector.broadcast %13 : vector<1x8xf32> to vector<8x8xf32>
    %16 = arith.subf %14, %15 : vector<8x8xf32>
    %17 = arith.mulf %16, %16 : vector<8x8xf32>
    %18 = arith.addf %11, %17 : vector<8x8xf32>
    %19 = vector.extract_strided_slice %1 {offsets = [0, 2], sizes = [8, 1], strides = [1, 1]} : vector<8x3xf32> to vector<8x1xf32>
    %20 = vector.extract_strided_slice %3 {offsets = [2, 0], sizes = [1, 8], strides = [1, 1]} : vector<3x8xf32> to vector<1x8xf32>
    %21 = vector.broadcast %19 : vector<8x1xf32> to vector<8x8xf32>
    %22 = vector.broadcast %20 : vector<1x8xf32> to vector<8x8xf32>
    %23 = arith.subf %21, %22 : vector<8x8xf32>
    %24 = arith.mulf %23, %23 : vector<8x8xf32>
    %25 = arith.addf %18, %24 : vector<8x8xf32>
    %cst_5 = arith.constant 9.99999996E-13 : f32
    %26 = vector.broadcast %cst_5 : f32 to vector<8x8xf32>
    %27 = arith.subf %26, %25 : vector<8x8xf32>
    %cst_6 = arith.constant 1.000000e+00 : f32
    %28 = vector.broadcast %cst_6 : f32 to vector<8x8xf32>
    %29 = arith.mulf %28, %27 : vector<8x8xf32>
    %30 = math.exp %29 : vector<8x8xf32>
    %c0_7 = arith.constant 0 : index
    %c0_8 = arith.constant 0 : index
    %31 = vector.load %arg4[%c0_7, %c0_8] : memref<1x64xf32, #tpu.memory_space<vmem>>, vector<1x64xf32>
    %32 = vector.shape_cast %31 : vector<1x64xf32> to vector<1x1x64xf32>
    %c0_9 = arith.constant 0 : index
    %c0_10 = arith.constant 0 : index
    %33 = vector.load %arg5[%c0_9, %c0_10] : memref<1x64xf32, #tpu.memory_space<vmem>>, vector<1x64xf32>
    %34 = vector.shape_cast %33 : vector<1x64xf32> to vector<1x1x64xf32>
    %35 = vector.shape_cast %30 : vector<8x8xf32> to vector<8x8x1xf32>
    %36 = vector.broadcast %35 : vector<8x8x1xf32> to vector<8x8x64xf32>
    %37 = vector.broadcast %32 : vector<1x1x64xf32> to vector<8x8x64xf32>
    %38 = arith.subf %36, %37 : vector<8x8x64xf32>
    %cst_11 = arith.constant 0.000000e+00 : f32
    %39 = vector.broadcast %cst_11 : f32 to vector<1x1x64xf32>
    %40 = arith.subf %39, %34 : vector<1x1x64xf32>
    %41 = vector.broadcast %40 : vector<1x1x64xf32> to vector<8x8x64xf32>
    %42 = arith.mulf %41, %38 : vector<8x8x64xf32>
    %43 = arith.mulf %42, %38 : vector<8x8x64xf32>
    %44 = math.exp %43 : vector<8x8x64xf32>
    %45 = vector.shape_cast %44 : vector<8x8x64xf32> to vector<64x64xf32>
    %c0_12 = arith.constant 0 : index
    %c0_13 = arith.constant 0 : index
    %46 = vector.load %arg6[%c0_12, %c0_13] : memref<64x32xf32, #tpu.memory_space<vmem>>, vector<64x32xf32>
    %cst_14 = arith.constant dense<0.000000e+00> : vector<64x32xf32>
    %47 = tpu.matmul %45, %46, %cst_14 {dimension_numbers = #tpu.dot_dimension_numbers<[1], [0], [0], [1], [0, 0, 1, 1], [], []>} : vector<64x64xf32>, vector<64x32xf32>, vector<64x32xf32> -> vector<64x32xf32>
    %c0_15 = arith.constant 0 : index
    %c0_16 = arith.constant 0 : index
    %48 = vector.load %arg7[%c0_15, %c0_16] : memref<1x32xf32, #tpu.memory_space<vmem>>, vector<1x32xf32>
    %49 = vector.broadcast %48 : vector<1x32xf32> to vector<64x32xf32>
    %50 = arith.addf %47, %49 : vector<64x32xf32>
    %51 = arith.negf %50 : vector<64x32xf32>
    %52 = math.exp %51 : vector<64x32xf32>
    %cst_17 = arith.constant 1.000000e+00 : f32
    %53 = vector.broadcast %cst_17 : f32 to vector<64x32xf32>
    %54 = arith.addf %53, %52 : vector<64x32xf32>
    %55 = arith.divf %53, %54 : vector<64x32xf32>
    %56 = arith.mulf %50, %55 : vector<64x32xf32>
    %57 = vector.shape_cast %56 : vector<64x32xf32> to vector<8x8x32xf32>
    %cst_18 = arith.constant dense<0.000000e+00> : vector<8x32xf32>
    %58 = vector.multi_reduction <add>, %57, %cst_18 [1] : vector<8x8x32xf32> to vector<8x32xf32>
    %cst_19 = arith.constant 8.000000e+00 : f32
    %59 = vector.broadcast %cst_19 : f32 to vector<8x32xf32>
    %60 = arith.divf %58, %59 : vector<8x32xf32>
    %c0_20 = arith.constant 0 : index
    %c0_21 = arith.constant 0 : index
    %61 = vector.load %arg8[%c0_20, %c0_21] : memref<32x32xf32, #tpu.memory_space<vmem>>, vector<32x32xf32>
    %cst_22 = arith.constant dense<0.000000e+00> : vector<8x32xf32>
    %62 = tpu.matmul %60, %61, %cst_22 {dimension_numbers = #tpu.dot_dimension_numbers<[1], [0], [0], [1], [0, 0, 1, 1], [], []>} : vector<8x32xf32>, vector<32x32xf32>, vector<8x32xf32> -> vector<8x32xf32>
    %c0_23 = arith.constant 0 : index
    %c0_24 = arith.constant 0 : index
    %63 = vector.load %arg9[%c0_23, %c0_24] : memref<1x32xf32, #tpu.memory_space<vmem>>, vector<1x32xf32>
    %64 = vector.broadcast %63 : vector<1x32xf32> to vector<8x32xf32>
    %65 = arith.addf %62, %64 : vector<8x32xf32>
    %c0_25 = arith.constant 0 : index
    %c0_26 = arith.constant 0 : index
    %c0_27 = arith.constant 0 : index
    %66 = vector.load %arg10[%c0_25, %c0_26, %c0_27] : memref<1x8x32xf32, #tpu.memory_space<vmem>>, vector<1x8x32xf32>
    %67 = vector.shape_cast %66 : vector<1x8x32xf32> to vector<8x32xf32>
    %68 = vector.shape_cast %65 : vector<8x32xf32> to vector<1x8x32xf32>
    tpu.vector_store %arg10[%c0_25, %c0_26, %c0_27], %68 {strides = array<i32>} : memref<1x8x32xf32, #tpu.memory_space<vmem>>, vector<1x8x32xf32>,
    return
  }
  func.func @transform_0(%arg0: i32, %arg1: i32) -> (i32, i32, i32) {
    %c0_i32 = arith.constant 0 : i32
    %c0_i32_0 = arith.constant 0 : i32
    return %arg0, %arg1, %c0_i32 : i32, i32, i32
  }
  func.func @transform_1(%arg0: i32, %arg1: i32) -> (i32, i32, i32) {
    %c0_i32 = arith.constant 0 : i32
    %c0_i32_0 = arith.constant 0 : i32
    %c0_i32_1 = arith.constant 0 : i32
    return %arg0, %c0_i32, %c0_i32_0 : i32, i32, i32
  }
  func.func @transform_2(%arg0: i32, %arg1: i32) -> (i32, i32) {
    %c0_i32 = arith.constant 0 : i32
    %c0_i32_0 = arith.constant 0 : i32
    %c0_i32_1 = arith.constant 0 : i32
    return %c0_i32, %c0_i32_0 : i32, i32
  }
  func.func @transform_3(%arg0: i32, %arg1: i32) -> (i32, i32) {
    %c0_i32 = arith.constant 0 : i32
    %c0_i32_0 = arith.constant 0 : i32
    %c0_i32_1 = arith.constant 0 : i32
    return %c0_i32, %c0_i32_0 : i32, i32
  }
  func.func @transform_4(%arg0: i32, %arg1: i32) -> (i32, i32) {
    %c0_i32 = arith.constant 0 : i32
    %c0_i32_0 = arith.constant 0 : i32
    %c0_i32_1 = arith.constant 0 : i32
    return %c0_i32, %c0_i32_0 : i32, i32
  }
  func.func @transform_5(%arg0: i32, %arg1: i32) -> (i32, i32) {
    %c0_i32 = arith.constant 0 : i32
    %c0_i32_0 = arith.constant 0 : i32
    %c0_i32_1 = arith.constant 0 : i32
    return %c0_i32, %c0_i32_0 : i32, i32
  }
  func.func @transform_6(%arg0: i32, %arg1: i32) -> (i32, i32) {
    %c0_i32 = arith.constant 0 : i32
    %c0_i32_0 = arith.constant 0 : i32
    %c0_i32_1 = arith.constant 0 : i32
    return %c0_i32, %c0_i32_0 : i32, i32
  }
  func.func @transform_7(%arg0: i32, %arg1: i32) -> (i32, i32) {
    %c0_i32 = arith.constant 0 : i32
    %c0_i32_0 = arith.constant 0 : i32
    %c0_i32_1 = arith.constant 0 : i32
    return %c0_i32, %c0_i32_0 : i32, i32
  }
  func.func @transform_8(%arg0: i32, %arg1: i32) -> (i32, i32, i32) {
    %c0_i32 = arith.constant 0 : i32
    %c0_i32_0 = arith.constant 0 : i32
    return %arg0, %arg1, %c0_i32 : i32, i32, i32
  }
}

</mosaic_0001>

<bundles_post_ra>
// kernel: smeared_forward.1
= control target key start
LH: loop header
LB: loop body
LE: loop exit
PB: predicated region body
PF: predicated region fallthrough
CT: control target
= control target key end

     0   :  { %13 = vsyncpa [#allocation3], 0  ;;  %s1500_s0 = inlined_call_operand.vmem [shape: f32[2,8,3], index: 0, kind: input, shape index: {}]   ;;  %s1501_s1 = inlined_call_operand.vmem [shape: f32[2,3,8], index: 1, kind: input, shape index: {}]   ;;  %s1502_s2 = inlined_call_operand.vmem [shape: f32[1,64], index: 2, kind: input, shape index: {}]   ;;  %s1503_s3 = inlined_call_operand.vmem [shape: f32[1,64], index: 3, kind: input, shape index: {}]   ;;  %s1504_s4 = inlined_call_operand.vmem [shape: f32[64,32], index: 4, kind: input, shape index: {}]   ;;  %s1505_s5 = inlined_call_operand.vmem [shape: f32[1,32], index: 5, kind: input, shape index: {}]   ;;  %s1506_s6 = inlined_call_operand.vmem [shape: f32[32,32], index: 6, kind: input, shape index: {}]   ;;  %s1507_s7 = inlined_call_operand.vmem [shape: f32[1,32], index: 7, kind: input, shape index: {}]   ;;  %s1508_s8 = inlined_call_operand.hbm [shape: f32[2,8,32], index: 8, kind: output, shape index: {}]  }
   0x1   :  { %15 = vsyncpa [#allocation3 + $0x1], 0  ;;  %s1299_s27 = smov 0   ;;  %s1301_s28 = smov 0  }
   0x2   :  { %s1303_s29 = smov 0   ;;  %s1305_s30 = smov 0  }
   0x3   :  { %s1307_s9 = smov 0   ;;  %s1309_s10 = smov 0  }
   0x4 LB: > { %s964_s11 = sadd.s32 4294967295, %s1246_s10   ;;  %s965_s12 = sadd.s32 4294967294, %s1246_s10   ;;  %s1246_s10 = sphi %s1309_s10, %s21_s10   ;;  %s1242_s9 = sphi %s1307_s9, %s1515_s9   ;;  %s1238_s30 = sphi %s1305_s30, %s1514_s30   ;;  %s1234_s29 = sphi %s1303_s29, %s1513_s29   ;;  %s1230_s28 = sphi %s1301_s28, %s1512_s28   ;;  %s1226_s27 = sphi %s1299_s27, %s1511_s27  }
   0x5   : > { %s33_s13 = sadd.s32 1, %s1242_s9  ;;  %s222_s14 = sadd.s32 1, %s1234_s29 }
   0x6   : > { %p35_p0 = scmp.ge.s32.totalorder %s33_s13, 2  ;;  %p232_p1 = scmp.ne.s32.totalorder %s1234_s29, %s1230_s28 }
   0x7   : > { %p233_p2 = scmp.eq.s32.totalorder %s964_s11, 1  ;;  %p238_p3 = scmp.ne.s32.totalorder %s1230_s28, %s1226_s27 }
   0x8   : > { %s1517_s13 = smov (%p35_p0, %s33_s13), 0  ;;  %p239_p5 = scmp.eq.s32.totalorder %s965_s12, 1 }
   0x9   : > { %p1339_p4 = por %p233_p2, %p232_p1  ;;  %s217_s16 = ssub.s32 %s1242_s9, %s1517_s13 }
   0xa   : > { %p968_p6 = scmp.ge.s32.totalorder %s1246_s10, 1  ;;  %p220_p7 = scmp.eq.s32.totalorder %s217_s16, 0 }
   0xb   : > { %p1346_p8 = por %p239_p5, %p238_p3  ;;  %p292_p9 = scmp.lt.s32.totalorder %s1246_s10, 3 }
   0xc   : > { %s1352_s18 = scalar_select %p220_p7, %s1234_s29, %s222_s14  }
   0xd   : > { %p293_p10 = pnand %p968_p6, %p292_p9 }
   0xe   : > { %p332_p11 = scmp.lt.s32.totalorder (!%p293_p10), %s1238_s30, 1  ;;  %s329_s22 = sand.u32 (!%p293_p10), 1, %s1230_s28  }
   0xf   : > { %296 = sbr.rel (%p293_p10) target bundleno = 791 (0x317), region = 52  ;;  %s993_s26 = sshll.u32 (!%p293_p10), %s1238_s30, 7 }
  0x14   : > { %v1248_v0 = vmov 0   ;;  %v1249_v1 = vmov 2   ;;  %s333_s19 = scalar_select %p332_p11, %s1238_s30, 1  ;;  %v1250_v3 = vmov 1   ;;  %v350_v4 = vlaneseq  ;;  %v500_v27 = vld [vmem:[%s1504_s4 + $0x38] sm:$0xff]  ;;  %v499_v31 = vld [vmem:[%s1504_s4 + $0x30] sm:$0xff] }
  0x15   : > { %1116 = vset.pattern.permute.xlu0 %v1248_v0  ;;  %1118 = vset.pattern.permute.xlu1 %v1249_v1  ;;  %v498_v32 = vld [vmem:[%s1504_s4 + $0x28] sm:$0xff]  ;;  %v497_v37 = vld [vmem:[%s1504_s4 + $0x20] sm:$0xff]  ;;  %v496_v41 = vld [vmem:[%s1504_s4 + $0x18] sm:$0xff]  ;;  %vm508_vm0 = vcmask 523264   ;;  %vm1252_vm1 = vmmov 0   ;;  %vm694_vm2 = vcmask 261120  }
  0x16   : > { %s970_s20 = sshll.u32 %s333_s19, 3  ;;  %s971_s24 = sshll.u32 %s333_s19, 2  ;;  %v1359_v5 = vshrl.u32 %v350_v4, 7  ;;  %1017 = vmatprep.subr.mxu0 %v500_v27  ;;  %v495_v42 = vld [vmem:[%s1504_s4 + $0x10] sm:$0xff]  ;;  %v494_v45 = vld [vmem:[%s1504_s4 + $0x8] sm:$0xff]  ;;  %v493_v46 = vld [vmem:[%s1504_s4] sm:$0xff] }
  0x17   : > { %s338_s23 = scalar_lea.vmem %s1500_s0, %s970_s20  ;;  %s342_s11 = scalar_lea.vmem %s1501_s1, %s971_s24  ;;  %1018 = vmatpush3.msra.mxu0 %v500_v27  ;;  %v383_v48 = vld [vmem:[%s1503_s3] sm:$0x1]  ;;  %vm779_vm3 = vcmask 1041409   ;;  %vm781_vm4 = vcmask 1042434   ;;  %vm783_vm5 = vcmask 1043459   ;;  %vm785_vm6 = vcmask 1044484  }
  0x18   : > { %v343_v2 = vld [vmem:[%s338_s23] sm:$0xff]  ;;  %v1365_v6 = vsub.s32 0, %v1359_v5  ;;  %v374_v7 = vsub.s32 2, %v1359_v5  ;;  %v363_v9 = vsub.s32 1, %v1359_v5  ;;  %v414_v30 = vsub.s32 4, %v1359_v5  ;;  %1019 = vmatprep.subr.mxu0 %v499_v31  ;;  %s969_s23 = sshll.u32 %s329_s22, 3  ;;  %s1459_s19 = scalar_lea.hbm %s1508_s8, %s993_s26 }
  0x19   : > { %347 = vperm.xlu0 %1116, %v343_v2   ;;  %369 = vperm.xlu1 %1118, %v343_v2   ;;  %v344_v8 = vld [vmem:[%s342_s11] sm:$0x7]  ;;  %v428_v35 = vsub.s32 6, %v1359_v5  ;;  %v407_v36 = vsub.s32 3, %v1359_v5  ;;  %v421_v40 = vsub.s32 5, %v1359_v5  ;;  %v435_v44 = vsub.s32 7, %v1359_v5 }
  0x1a   : > { %v353_v10 = vrot.slane %v344_v8, %v1365_v6  ;;  %v375_v12 = vrot.slane %v344_v8, %v374_v7  ;;  %v364_v14 = vrot.slane %v344_v8, %v363_v9  ;;  %1020 = vmatpush3.msra.mxu0 %v499_v31  ;;  %v454_v49 = vsub.f32 0.0, %v383_v48  ;;  %v972_v50 = vld [vmem:[%s1502_s2] ss:$0 sm:$0xff]  ;;  %s331_s11 = scalar_lea.vmem [#allocation2], %s969_s23  ;;  %s867_s20 = scalar_lea.sflag [#allocation3], %s329_s22 }
  0x1b   : > { %1021 = vmatprep.subr.mxu0 %v498_v32  ;;  %vm787_vm7 = vcmask 1045509   ;;  %vm789_vm8 = vcmask 1046534   ;;  %vm791_vm9 = vcmask 1047559   ;;  %s881_s12 = sshll.u32 %s331_s11, 4  ;;  %s1253_s30 = smov [#allocation2]   ;;  %s882_s12 = int_to_ptr.vmem [resolvable:$true] %s881_s12 }
  0x1c   : > { %1022 = vmatpush3.msra.mxu0 %v498_v32  ;;  %v459_v51 = vrot.slane %v454_v49, %v1365_v6  ;;  %s1170_s21 = scalar_lea.vmem %s882_s12, 128  ;;  %s1174_s23 = sshll.u32 %s1253_s30, 4  ;;  %s1175_s23 = int_to_ptr.vmem [resolvable:$false] %s1174_s23 }
  0x1d   : > { %1117 = vset.pattern.permute.xlu0 %v1250_v3  ;;  %1023 = vmatprep.subr.mxu0 %v497_v37  ;;  %p1171_p12 = scmp.ne.s32.totalorder %s882_s12, %s1170_s21  ;;  %s1176_s24 = scalar_lea.vmem %s1175_s23, 256 }
  0x1e   : > { %358 = vperm.xlu0 %1117, %v343_v2   ;;  %1024 = vmatpush3.msra.mxu0 %v497_v37  ;;  %v763_v37 = vld [vmem:[%s1506_s6 + $0x18] sm:$0xff]  ;;  %p1177_p1 = scmp.lt.s32.totalorder %s882_s12, %s1175_s23  ;;  %p1178_p2 = scmp.lt.s32.totalorder %s1176_s24, %s1170_s21 }
  0x1f   : > { %1025 = vmatprep.subr.mxu0 %v496_v41  ;;  %p1172_p13 = pnand %p1171_p12, %p1339_p4 }
  0x20   : > { %1026 = vmatpush3.msra.mxu0 %v496_v41  ;;  %v973_v41 = vld [vmem:[%s1505_s5] ss:$0 sm:$0xff]  ;;  %p1179_p3 = por %p1178_p2, %p1177_p1 }
  0x21   : > { %1027 = vmatprep.subr.mxu0 %v495_v42  ;;  %p1173_p0 = pneg %p1172_p13 }
  0x22   : > { %1119 = vset.pattern.permute.xlu0 %v1249_v1  ;;  %1028 = vmatpush3.msra.mxu0 %v495_v42 }
  0x23   : > { %1029 = vmatprep.subr.mxu0 %v494_v45  ;;  %p1180_p5 = pnand %p1179_p3, %p1173_p0 }
  0x24   : > { %1030 = vmatpush3.msra.mxu0 %v494_v45 }
  0x25   : > { %1031 = vmatprep.subr.mxu0 %v493_v46 }
  0x26   : > { %1032 = vmatpush3.msra.mxu0 %v493_v46 }
  0x94   : > { %v348_v11 = vpop.permute.xlu0 %347  ;;  %v370_v13 = vpop.permute.xlu1 %369 }
  0x95   : > { %v354_v15 = vsub.f32 %v348_v11, %v353_v10  ;;  %v376_v16 = vsub.f32 %v370_v13, %v375_v12 }
  0x97   : > { %v355_v19 = vmul.f32 %v354_v15, %v354_v15  ;;  %v377_v21 = vmul.f32 %v376_v16, %v376_v16 }
  0x99   : > { %v359_v17 = vpop.permute.xlu0 %358 }
  0x9a   : > { %v365_v18 = vsub.f32 %v359_v17, %v364_v14 }
  0x9c   : > { %v366_v20 = vmul.f32 %v365_v18, %v365_v18 }
  0x9e   : > { %v367_v22 = vadd.f32 %v366_v20, %v355_v19 }
  0xa0   : > { %v378_v23 = vadd.f32 %v377_v21, %v367_v22 }
  0xa2   : > { %v379_v24 = vsub.f32 1e-12, %v378_v23 }
  0xa4   : > { %v380_v25 = vmul.f32 1.442695, %v379_v24 }
  0xa6   : > { %1120 = vpow2.f32 %v380_v25 }
  0xb3   : > { %v1121_v26 = vpop.eup %1120 }
  0xb4   : > { %v401_v28 = vrot.slane %v1121_v26, %v374_v7  ;;  %v387_v29 = vrot.slane %v1121_v26, %v1365_v6  ;;  %v415_v33 = vrot.slane %v1121_v26, %v414_v30  ;;  %v394_v34 = vrot.slane %v1121_v26, %v363_v9 }
  0xb5   : > { %v429_v38 = vrot.slane %v1121_v26, %v428_v35  ;;  %v408_v39 = vrot.slane %v1121_v26, %v407_v36  ;;  %v422_v43 = vrot.slane %v1121_v26, %v421_v40  ;;  %v436_v47 = vrot.slane %v1121_v26, %v435_v44  ;;  %v760_v40 = vld [vmem:[%s1506_s6] sm:$0xff] }
  0xb6   : > { %403 = vbcast.lane.b32.xlu0 %v401_v28, 256  ;;  %389 = vbcast.lane.b32.xlu1 %v387_v29, 256  ;;  %v1251_v36 = vmov 0.0  }
  0xb7   : > { %1045 = vmatprep.subr.mxu1 %v1251_v36  ;;  %1053 = vmatprep.mubr.msk.f32.mxu1 %vm1252_vm1, %v1251_v36 }
  0xb8   : > { %1046 = vmatpush3.msra.mxu1 %v763_v37 }
  0xb9   : > { %1047 = vmatprep.subr.mxu1 %v1251_v36 }
  0xba   : > { %417 = vbcast.lane.b32.xlu0 %v415_v33, 256  ;;  %396 = vbcast.lane.b32.xlu1 %v394_v34, 256 }
  0xbe   : > { %431 = vbcast.lane.b32.xlu0 %v429_v38, 256  ;;  %410 = vbcast.lane.b32.xlu1 %v408_v39, 256  ;;  %v762_v38 = vld [vmem:[%s1506_s6 + $0x10] sm:$0xff]  ;;  %v761_v39 = vld [vmem:[%s1506_s6 + $0x8] sm:$0xff] }
  0xbf   : > { %1048 = vmatpush3.msra.mxu1 %v762_v38 }
  0xc0   : > { %1049 = vmatprep.subr.mxu1 %v1251_v36 }
  0xc1   : > { %1050 = vmatpush3.msra.mxu1 %v761_v39 }
  0xc2   : > { %424 = vbcast.lane.b32.xlu1 %v422_v43, 256  ;;  %1051 = vmatprep.subr.mxu1 %v1251_v36 }
  0xc3   : > { %1052 = vmatpush3.msra.mxu1 %v760_v40 }
  0xc6   : > { %438 = vbcast.lane.b32.xlu1 %v436_v47, 256 }
 0x128   : > { %v404_v52 = vpop.permute.xlu0 %403  ;;  %v390_v53 = vpop.permute.xlu1 %389 }
 0x129   : > { %v448_v54 = vsub.f32 %v404_v52, %v972_v50  ;;  %v446_v55 = vsub.f32 %v390_v53, %v972_v50 }
 0x12b   : > { %v463_v56 = vmul.f32 %v459_v51, %v448_v54  ;;  %v461_v57 = vmul.f32 %v459_v51, %v446_v55 }
 0x12c   : > { %v418_v58 = vpop.permute.xlu0 %417  ;;  %v397_v59 = vpop.permute.xlu1 %396 }
 0x12d   : > { %v469_v60 = vmul.f32 %v461_v57, %v446_v55  ;;  %v450_v61 = vsub.f32 %v418_v58, %v972_v50  ;;  %v447_v62 = vsub.f32 %v397_v59, %v972_v50  ;;  %v471_v63 = vmul.f32 %v463_v56, %v448_v54 }
 0x12f   : > { %v477_v0 = vmul.f32 1.442695, %v469_v60  ;;  %v465_v1 = vmul.f32 %v459_v51, %v450_v61  ;;  %v462_v2 = vmul.f32 %v459_v51, %v447_v62  ;;  %v481_v8 = vmul.f32 1.442695, %v471_v63 }
 0x130   : > { %v432_v3 = vpop.permute.xlu0 %431  ;;  %v411_v4 = vpop.permute.xlu1 %410 }
 0x131   : > { %v470_v5 = vmul.f32 %v462_v2, %v447_v62  ;;  %v452_v7 = vsub.f32 %v432_v3, %v972_v50  ;;  %1122 = vpow2.f32 %v477_v0  ;;  %v449_v6 = vsub.f32 %v411_v4, %v972_v50 }
 0x132   : > { %v473_v9 = vmul.f32 %v465_v1, %v450_v61 }
 0x133   : > { %v479_v10 = vmul.f32 1.442695, %v470_v5  ;;  %v467_v11 = vmul.f32 %v459_v51, %v452_v7  ;;  %v464_v12 = vmul.f32 %v459_v51, %v449_v6 }
 0x134   : > { %v425_v13 = vpop.permute.xlu1 %424  ;;  %v485_v16 = vmul.f32 1.442695, %v473_v9 }
 0x135   : > { %v451_v14 = vsub.f32 %v425_v13, %v972_v50  ;;  %1124 = vpow2.f32 %v479_v10  ;;  %v472_v15 = vmul.f32 %v464_v12, %v449_v6  ;;  %v475_v17 = vmul.f32 %v467_v11, %v452_v7 }
 0x136   : > { %1126 = vpow2.f32 %v481_v8 }
 0x137   : > { %v466_v18 = vmul.f32 %v459_v51, %v451_v14  ;;  %v483_v19 = vmul.f32 1.442695, %v472_v15  ;;  %v489_v23 = vmul.f32 1.442695, %v475_v17 }
 0x138   : > { %v439_v20 = vpop.permute.xlu1 %438 }
 0x139   : > { %v474_v21 = vmul.f32 %v466_v18, %v451_v14  ;;  %v453_v22 = vsub.f32 %v439_v20, %v972_v50  ;;  %1128 = vpow2.f32 %v483_v19 }
 0x13a   : > { %1130 = vpow2.f32 %v485_v16 }
 0x13b   : > { %v487_v24 = vmul.f32 1.442695, %v474_v21  ;;  %v468_v25 = vmul.f32 %v459_v51, %v453_v22 }
 0x13d   : > { %1132 = vpow2.f32 %v487_v24  ;;  %v476_v26 = vmul.f32 %v468_v25, %v453_v22 }
 0x13e   : > { %v1123_v27 = vpop.eup %1122  ;;  %1134 = vpow2.f32 %v489_v23 }
 0x13f   : > { %v491_v28 = vmul.f32 1.442695, %v476_v26  ;;  %1033 = vmatprep.mubr.msk.f32.mxu0 %vm508_vm0, %v1123_v27 }
 0x141   : > { %1136 = vpow2.f32 %v491_v28 }
 0x142   : > { %v1125_v29 = vpop.eup %1124 }
 0x143   : > { %v1127_v30 = vpop.eup %1126  ;;  %1034 = vmatmul.mubr.msk.f32.vlgmr.msra.gmra.mxu0 %vm508_vm0, %v1125_v29 }
 0x144   : > { %1036 = vmatprep.mubr.msk.f32.mxu0 %vm508_vm0, %v1127_v30 }
 0x146   : > { %v1129_v31 = vpop.eup %1128 }
 0x147   : > { %v1131_v32 = vpop.eup %1130  ;;  %1037 = vmatmul.mubr.msk.f32.gmra.mxu0 %vm508_vm0, %v1129_v31 }
 0x148   : > { %1039 = vmatprep.mubr.msk.f32.mxu0 %vm508_vm0, %v1131_v32 }
 0x14a   : > { %v1133_v33 = vpop.eup %1132 }
 0x14b   : > { %v1135_v34 = vpop.eup %1134  ;;  %1040 = vmatmul.mubr.msk.f32.gmra.mxu0 %vm508_vm0, %v1133_v33 }
 0x14c   : > { %1042 = vmatprep.mubr.msk.f32.mxu0 %vm508_vm0, %v1135_v34 }
 0x14e   : > { %v1137_v35 = vpop.eup %1136 }
 0x14f   : > { %1043 = vmatmul.mubr.msk.f32.gmra.mxu0 %vm508_vm0, %v1137_v35 }
 0x203   : > { %v1035_v42 = vpop.f32.mrf.mxu0 }
 0x204   : > { %v605_v43 = vadd.f32 %v1035_v42, %v973_v41 }
 0x205   : > { %v599_v44 = vpop.f32.mrf.mxu0 }
 0x206   : > { %v983_v45 = vmul.f32 -1.442695, %v605_v43  ;;  %v600_v46 = vadd.f32 %v973_v41, %v599_v44 }
 0x207   : > { %v1038_v47 = vpop.f32.mrf.mxu0 }
 0x208   : > { %1138 = vpow2.f32 %v983_v45  ;;  %v982_v48 = vmul.f32 -1.442695, %v600_v46  ;;  %v615_v49 = vadd.f32 %v1038_v47, %v973_v41 }
 0x209   : > { %v609_v50 = vpop.f32.mrf.mxu0 }
 0x20a   : > { %1140 = vpow2.f32 %v982_v48  ;;  %v985_v51 = vmul.f32 -1.442695, %v615_v49  ;;  %v610_v52 = vadd.f32 %v973_v41, %v609_v50 }
 0x20b   : > { %v1041_v53 = vpop.f32.mrf.mxu0 }
 0x20c   : > { %1142 = vpow2.f32 %v985_v51  ;;  %v984_v54 = vmul.f32 -1.442695, %v610_v52  ;;  %v625_v55 = vadd.f32 %v1041_v53, %v973_v41 }
 0x20d   : > { %v619_v56 = vpop.f32.mrf.mxu0 }
 0x20e   : > { %1144 = vpow2.f32 %v984_v54  ;;  %v987_v57 = vmul.f32 -1.442695, %v625_v55  ;;  %v1430_v58 = vadd.f32 %v973_v41, %v619_v56 }
 0x20f   : > { %v1044_v59 = vpop.f32.mrf.mxu0 }
 0x210   : > { %1146 = vpow2.f32 %v987_v57  ;;  %v986_v60 = vmul.f32 -1.442695, %v1430_v58  ;;  %v1433_v61 = vadd.f32 %v1044_v59, %v973_v41 }
 0x211   : > { %v629_v62 = vpop.f32.mrf.mxu0 }
 0x212   : > { %1148 = vpow2.f32 %v986_v60  ;;  %v989_v63 = vmul.f32 -1.442695, %v1433_v61  ;;  %v1436_v0 = vadd.f32 %v973_v41, %v629_v62 }
 0x214   : > { %1150 = vpow2.f32 %v989_v63  ;;  %v988_v1 = vmul.f32 -1.442695, %v1436_v0 }
 0x215   : > { %v1139_v2 = vpop.eup %1138 }
 0x216   : > { %v663_v3 = vadd.f32 1.0, %v1139_v2  ;;  %1152 = vpow2.f32 %v988_v1 }
 0x217   : > { %v1141_v4 = vpop.eup %1140 }
 0x218   : > { %1154 = vrcp.f32 %v663_v3  ;;  %v662_v5 = vadd.f32 1.0, %v1141_v4 }
 0x219   : > { %v1143_v7 = vpop.eup %1142 }
 0x21a   : > { %1156 = vrcp.f32 %v662_v5  ;;  %v665_v6 = vadd.f32 1.0, %v1143_v7 }
 0x21b   : > { %v1145_v8 = vpop.eup %1144 }
 0x21c   : > { %1158 = vrcp.f32 %v665_v6  ;;  %v664_v9 = vadd.f32 1.0, %v1145_v8 }
 0x21d   : > { %v1147_v10 = vpop.eup %1146 }
 0x21e   : > { %1160 = vrcp.f32 %v664_v9  ;;  %v667_v11 = vadd.f32 1.0, %v1147_v10 }
 0x21f   : > { %v1149_v12 = vpop.eup %1148 }
 0x220   : > { %1162 = vrcp.f32 %v667_v11  ;;  %v666_v13 = vadd.f32 1.0, %v1149_v12 }
 0x221   : > { %v1151_v14 = vpop.eup %1150 }
 0x222   : > { %1164 = vrcp.f32 %v666_v13  ;;  %v669_v15 = vadd.f32 1.0, %v1151_v14 }
 0x223   : > { %v1153_v16 = vpop.eup %1152 }
 0x224   : > { %1166 = vrcp.f32 %v669_v15  ;;  %v668_v17 = vadd.f32 1.0, %v1153_v16 }
 0x225   : > { %v1155_v18 = vpop.eup %1154 }
 0x226   : > { %v687_v19 = vmul.f32 %v1155_v18, %v605_v43  ;;  %1168 = vrcp.f32 %v668_v17 }
 0x227   : > { %v1157_v20 = vpop.eup %1156 }
 0x228   : > { %v702_v21 = vsel %vm694_vm2, %v687_v19, 0.0  ;;  %v686_v22 = vmul.f32 %v1157_v20, %v600_v46 }
 0x229   : > { %v1159_v23 = vpop.eup %1158  ;;  %v703_v24 = vrot.slane %v702_v21, 4 }
 0x22a   : > { %v695_v25 = vsel %vm694_vm2, %v686_v22, 0.0  ;;  %v689_v26 = vmul.f32 %v1159_v23, %v615_v49 }
 0x22b   : > { %v1161_v27 = vpop.eup %1160  ;;  %v704_v28 = vadd.f32 %v703_v24, %v702_v21  ;;  %v696_v29 = vrot.slane %v695_v25, 4 }
 0x22c   : > { %v716_v30 = vsel %vm694_vm2, %v689_v26, 0.0  ;;  %v688_v31 = vmul.f32 %v1161_v27, %v610_v52 }
 0x22d   : > { %v1163_v32 = vpop.eup %1162  ;;  %v705_v33 = vrot.slane %v704_v28, 2  ;;  %v697_v34 = vadd.f32 %v696_v29, %v695_v25  ;;  %v717_v35 = vrot.slane %v716_v30, 4 }
 0x22e   : > { %v709_v36 = vsel %vm694_vm2, %v688_v31, 0.0  ;;  %v691_v37 = vmul.f32 %v1163_v32, %v625_v55 }
 0x22f   : > { %v1165_v38 = vpop.eup %1164  ;;  %v706_v39 = vadd.f32 %v705_v33, %v704_v28  ;;  %v698_v40 = vrot.slane %v697_v34, 2  ;;  %v718_v41 = vadd.f32 %v717_v35, %v716_v30  ;;  %v710_v42 = vrot.slane %v709_v36, 4 }
 0x230   : > { %v730_v43 = vsel %vm694_vm2, %v691_v37, 0.0  ;;  %v690_v44 = vmul.f32 %v1165_v38, %v1430_v58 }
 0x231   : > { %v1167_v45 = vpop.eup %1166  ;;  %v699_v46 = vadd.f32 %v698_v40, %v697_v34  ;;  %v719_v47 = vrot.slane %v718_v41, 2  ;;  %v711_v48 = vadd.f32 %v710_v42, %v709_v36  ;;  %v731_v49 = vrot.slane %v730_v43, 4 }
 0x232   : > { %v723_v50 = vsel %vm694_vm2, %v690_v44, 0.0  ;;  %v693_v51 = vmul.f32 %v1167_v45, %v1433_v61  ;;  %v707_v53 = vrot.slane %v706_v39, 1 }
 0x233   : > { %v1169_v52 = vpop.eup %1168  ;;  %v700_v54 = vrot.slane %v699_v46, 1  ;;  %v720_v55 = vadd.f32 %v719_v47, %v718_v41  ;;  %v712_v56 = vrot.slane %v711_v48, 2  ;;  %v732_v57 = vadd.f32 %v731_v49, %v730_v43  ;;  %v990_v41 = vld [vmem:[%s1507_s7] ss:$0 sm:$0xff] }
 0x234   : > { %v724_v59 = vrot.slane %v723_v50, 4  ;;  %v744_v60 = vsel %vm694_vm2, %v693_v51, 0.0  ;;  %v692_v58 = vmul.f32 %v1169_v52, %v1436_v0  ;;  %v708_v5 = vadd.f32 %v707_v53, %v706_v39 }
 0x235   : > { %v701_v62 = vadd.f32 %v700_v54, %v699_v46  ;;  %v713_v63 = vadd.f32 %v712_v56, %v711_v48  ;;  %v733_v1 = vrot.slane %v732_v57, 2  ;;  %v745_v3 = vrot.slane %v744_v60, 4 }
 0x236   : > { %v725_v2 = vadd.f32 %v724_v59, %v723_v50  ;;  %v737_v4 = vsel %vm694_vm2, %v692_v58, 0.0  ;;  %v721_v61 = vrot.slane %v720_v55, 1  ;;  %v753_v16 = vmul.f32 0.125, %v708_v5 }
 0x237   : > { %v714_v7 = vrot.slane %v713_v63, 1  ;;  %v738_v6 = vrot.slane %v737_v4, 4  ;;  %v734_v8 = vadd.f32 %v733_v1, %v732_v57  ;;  %v746_v10 = vadd.f32 %v745_v3, %v744_v60 }
 0x238   : > { %v726_v9 = vrot.slane %v725_v2, 2  ;;  %v752_v11 = vmul.f32 0.125, %v701_v62  ;;  %v722_v17 = vadd.f32 %v721_v61, %v720_v55 }
 0x239   : > { %v715_v12 = vadd.f32 %v714_v7, %v713_v63  ;;  %v739_v13 = vadd.f32 %v738_v6, %v737_v4  ;;  %v735_v0 = vrot.slane %v734_v8, 1  ;;  %v747_v15 = vrot.slane %v746_v10, 2 }
 0x23a   : > { %v727_v14 = vadd.f32 %v726_v9, %v725_v2  ;;  %v780_v22 = vsel %vm779_vm3, %v753_v16, %v752_v11  ;;  %v755_v28 = vmul.f32 0.125, %v722_v17 }
 0x23b   : > { %v754_v18 = vmul.f32 0.125, %v715_v12  ;;  %v740_v19 = vrot.slane %v739_v13, 2  ;;  %v748_v21 = vadd.f32 %v747_v15, %v746_v10  ;;  %v736_v25 = vadd.f32 %v735_v0, %v734_v8 }
 0x23c   : > { %v728_v20 = vrot.slane %v727_v14, 1 }
 0x23d   : > { %v741_v23 = vadd.f32 %v740_v19, %v739_v13  ;;  %v782_v24 = vsel %vm781_vm4, %v754_v18, %v780_v22  ;;  %v749_v27 = vrot.slane %v748_v21, 1  ;;  %v757_v34 = vmul.f32 0.125, %v736_v25 }
 0x23e   : > { %v729_v26 = vadd.f32 %v728_v20, %v727_v14  ;;  %v784_v33 = vsel %vm783_vm5, %v755_v28, %v782_v24 }
 0x23f   : > { %v742_v29 = vrot.slane %v741_v23, 1  ;;  %v750_v31 = vadd.f32 %v749_v27, %v748_v21 }
 0x240   : > { %v756_v30 = vmul.f32 0.125, %v729_v26 }
 0x241   : > { %v743_v32 = vadd.f32 %v742_v29, %v741_v23  ;;  %v759_v37 = vmul.f32 0.125, %v750_v31 }
 0x242   : > { %v786_v35 = vsel %vm785_vm6, %v756_v30, %v784_v33 }
 0x243   : > { %v758_v36 = vmul.f32 0.125, %v743_v32  ;;  %v788_v38 = vsel %vm787_vm7, %v757_v34, %v786_v35 }
 0x245   : > { %v790_v39 = vsel %vm789_vm8, %v758_v36, %v788_v38 }
 0x246   : > { %v792_v40 = vsel %vm791_vm9, %v759_v37, %v790_v39 }
 0x247   : > { %1054 = vmatmul.mubr.msk.f32.vlgmr.msra.gmra.mxu1 %vm694_vm2, %v792_v40 }
 0x307   : > { %v861_v42 = vpop.f32.mrf.mxu1 }
 0x308   : > { %v862_v43 = vadd.f32 %v990_v41, %v861_v42 }
 0x309   : > { %v1055_v44 = vpop.f32.mrf.mxu1 }
 0x30a   : > { %865 = vst.msk [vmem:[%s331_s11] sm:$0xff] %vm694_vm2, %v862_v43 }
 0x30b   : > { %1183 = shalt.err (!%p1180_p5)
}
 0x30c   : > { %s1184_s25 = scalar_lea.hbm %s1459_s19, 128  ;;  %s1188_s11 = scalar_lea.hbm %s1508_s8, 256 }
 0x30d   : > { %p1185_p6 = scmp.ne.s32.totalorder %s1459_s19, %s1184_s25  ;;  %p1189_p10 = scmp.lt.s32.totalorder %s1459_s19, %s1508_s8 }
 0x30e   : > { %p1190_p11 = scmp.lt.s32.totalorder %s1188_s11, %s1184_s25 }
 0x30f   : > { %p1186_p7 = pnand %p1185_p6, %p1339_p4 }
 0x310   : > { %p1191_p12 = por %p1190_p11, %p1189_p10 }
 0x311   : > { %p1187_p9 = pneg %p1186_p7 }
 0x313   : > { %p1192_p13 = pnand %p1191_p12, %p1187_p9 }
 0x315   : > { %1195 = shalt.err (!%p1192_p13)
}
 0x316   : > { %1056 = dma.vmem_to_hbm [thread:$0]  (%p1339_p4), %s882_s12, 128, %s1459_s19, %s867_s20  }
 0x317 PF: > { %p1062_p0 = scmp.ge.s32.totalorder %s1246_s10, 2  ;;  %s893_s21 = sand.u32 1, %s1226_s27  }
 0x318   : > { %s894_s30 = scalar_lea.sflag [#allocation3], %s893_s21 }
 0x319   : > { %p1059_p1 = pnand %p1062_p0, %p1346_p8 }
 0x31b   : > { %p1060_p2 = pneg %p1059_p1 }
 0x31d   : > { %1221 = dma.done.wait (%p1060_p2), %s894_s30, 128  }
 0x31e   : > { %1223 = vsyncadd (%p1060_p2), %s894_s30, 4294967168  ;;  %s21_s10 = sadd.s32 1, %s1246_s10   ;;  %s1511_s27 = smov %s1230_s28 }
 0x31f   : > { %p18_p3 = scmp.ge.s32.totalorder %s21_s10, 4   ;;  %s1512_s28 = smov %s1234_s29 }
 0x320   : > { %s1513_s29 = smov %s1352_s18  ;;  %s1514_s30 = smov %s1242_s9 }
 0x321   : > { %s1515_s9 = smov %s1517_s13  ;;  %20 = sbr.rel (!%p18_p3) target bundleno = 4 (0x4), region = 90 }
 0x326   :  { %899 = vsyncpa [#allocation3], 1 }
 0x327   :  { %901 = vsyncpa [#allocation3 + $0x1], 1 }

</bundles_post_ra>
